<compile_context>
chip_gen: v7x
topology: tpu7x:2x2x1
jax: 0.10.0
libtpu: 0.0.40
codegen_flags: <defaults>
</compile_context>

<pallas_src>
import functools

import jax
import jax.numpy as jnp
from jax import lax
from jax.experimental import pallas as pl
from jax.experimental.pallas import tpu as pltpu


# ----------------------------------------------------------------------------
# helpers
# ----------------------------------------------------------------------------
def _round_up(x, m):
    return ((x + m - 1) // m) * m


def _vmem_limit_bytes():
    """Generation-aware VMEM budget: ~75% of physical, capped at 96 MiB.

    v5e/v6e (128 MiB physical) -> 96 MiB; v7x (64 MiB) -> 48 MiB.
    Falls back to a safe 48 MiB if the hardware query is unavailable.
    """
    cap = 64 * 1024 * 1024
    try:
        info = pltpu.get_tpu_info()
        cap = int(getattr(info, "vmem_capacity_bytes", cap) or cap)
    except Exception:
        pass
    return int(min(cap * 3 // 4, 96 * 1024 * 1024))


def _choose_tk(din, tk):
    """Pick a contraction tile: whole Din when small, else a clean divisor."""
    if tk is None:
        tk = 512 if din > 2048 else din
    tk = min(tk, din)
    if din % tk != 0 or (tk != din and tk % 128 != 0):
        return din  # fall back to whole-Din contraction (always correct)
    return tk


def _layer_norm(y, gamma, beta, eps):
    """LayerNorm over the last axis (biased variance, eps inside sqrt) in f32."""
    mean = jnp.mean(y, axis=-1, keepdims=True)
    yc = y - mean
    var = jnp.mean(yc * yc, axis=-1, keepdims=True)
    return yc * lax.rsqrt(var + eps) * gamma + beta


# ----------------------------------------------------------------------------
# kernels
# ----------------------------------------------------------------------------
def _postnorm_linear_kernel(x_ref, w_ref, p_ref, o_ref, *, eps, mxu_dtype):
    """o = LayerNorm(x @ w + b) for one row tile, whole-Din contraction.

    x_ref : (TM, Din)  activations (native dtype, cast to bf16 here)
    w_ref : (Din, D)   weights (constant block index -> stays resident)
    p_ref : (3, D)     packed f32 [linear bias; LN gamma; LN beta]
    o_ref : (TM, D)    output tile (lane-dense last dim)
    """
    y = jnp.dot(x_ref[...].astype(mxu_dtype), w_ref[...].astype(mxu_dtype),
                preferred_element_type=jnp.float32)
    y = y + p_ref[0:1, :]
    o_ref[...] = _layer_norm(y, p_ref[1:2, :], p_ref[2:3, :], eps).astype(o_ref.dtype)


def _postnorm_linear_kernel_ktiled(x_ref, w_ref, p_ref, o_ref, acc_ref, *,
                                   eps, mxu_dtype):
    """Same as above but with the Din contraction tiled on grid axis 1."""
    k = pl.program_id(1)

    @pl.when(k == 0)
    def _():
        acc_ref[...] = jnp.zeros_like(acc_ref)

    acc_ref[...] += jnp.dot(x_ref[...].astype(mxu_dtype),
                            w_ref[...].astype(mxu_dtype),
                            preferred_element_type=jnp.float32)

    @pl.when(k == pl.num_programs(1) - 1)
    def _():
        y = acc_ref[...] + p_ref[0:1, :]
        o_ref[...] = _layer_norm(y, p_ref[1:2, :], p_ref[2:3, :], eps).astype(o_ref.dtype)


def _layernorm_kernel(y_ref, p_ref, o_ref, *, eps):
    """o = LayerNorm(y) for one row tile (generic-fn path).  p = [gamma; beta]."""
    y = y_ref[...].astype(jnp.float32)
    o_ref[...] = _layer_norm(y, p_ref[0:1, :], p_ref[1:2, :], eps).astype(o_ref.dtype)


# ----------------------------------------------------------------------------
# wrappers
# ----------------------------------------------------------------------------
def post_norm_linear(x, w, b, gamma, beta, *, eps=1e-5, tm=256, tk=None,
                     out_dtype=None, mxu_dtype=jnp.bfloat16):
    """Fused PostNorm with fn = Linear: LayerNorm(x @ w + b).  x: (..., Din)."""
    din, d = w.shape
    lead = x.shape[:-1]
    x2 = x.reshape(-1, din)
    m = x2.shape[0]
    if out_dtype is None:
        out_dtype = x.dtype

    tm = max(8, min(_round_up(tm, 8), _round_up(m, 8)))   # sublane-aligned
    tk = _choose_tk(din, tk)
    nk = din // tk
    grid_rows = pl.cdiv(m, tm)                            # no jnp.pad copy

    # b / gamma / beta packed into one small f32 operand: one DMA, one block.
    params = jnp.stack([b, gamma, beta]).astype(jnp.float32)   # (3, D)

    compiler_params = pltpu.CompilerParams(
        dimension_semantics=("parallel",) if nk == 1
        else ("parallel", "arbitrary"),
        vmem_limit_bytes=_vmem_limit_bytes(),
    )

    if nk == 1:
        out = pl.pallas_call(
            functools.partial(_postnorm_linear_kernel, eps=eps, mxu_dtype=mxu_dtype),
            out_shape=jax.ShapeDtypeStruct((m, d), out_dtype),
            grid=(grid_rows,),
            in_specs=[
                pl.BlockSpec((tm, din), lambda i: (i, 0)),   # activation row tiles
                pl.BlockSpec((din, d), lambda i: (0, 0)),    # weights, resident
                pl.BlockSpec((3, d), lambda i: (0, 0)),      # bias/gamma/beta
            ],
            out_specs=pl.BlockSpec((tm, d), lambda i: (i, 0)),
            compiler_params=compiler_params,
        )(x2, w, params)
    else:
        # Large Din: tile the contraction so the per-buffer weight block is
        # tk x D (keeps VMEM bounded on v7x) and accumulate in f32 scratch.
        out = pl.pallas_call(
            functools.partial(_postnorm_linear_kernel_ktiled, eps=eps,
                              mxu_dtype=mxu_dtype),
            out_shape=jax.ShapeDtypeStruct((m, d), out_dtype),
            grid=(grid_rows, nk),
            in_specs=[
                pl.BlockSpec((tm, tk), lambda i, k: (i, k)),
                pl.BlockSpec((tk, d), lambda i, k: (k, 0)),
                pl.BlockSpec((3, d), lambda i, k: (0, 0)),
            ],
            out_specs=pl.BlockSpec((tm, d), lambda i, k: (i, 0)),
            scratch_shapes=[pltpu.VMEM((tm, d), jnp.float32)],
            compiler_params=compiler_params,
        )(x2, w, params)

    return out.reshape(lead + (d,))


def post_norm(x, fn, gamma, beta, *, eps=1e-5, tm=512, out_dtype=None, **kwargs):
    """Generic PostNorm: LayerNorm(fn(x, **kwargs)); LayerNorm is the kernel.

    y is passed in its native dtype (no forced f32 read) and the output dtype
    defaults to y's dtype.
    """
    y = fn(x, **kwargs)
    d = y.shape[-1]
    y2 = y.reshape(-1, d)
    m = y2.shape[0]
    if out_dtype is None:
        out_dtype = y.dtype

    tm = max(8, min(_round_up(tm, 8), _round_up(m, 8)))
    params = jnp.stack([gamma, beta]).astype(jnp.float32)   # (2, D)

    out = pl.pallas_call(
        functools.partial(_layernorm_kernel, eps=eps),
        out_shape=jax.ShapeDtypeStruct((m, d), out_dtype),
        grid=(pl.cdiv(m, tm),),
        in_specs=[
            pl.BlockSpec((tm, d), lambda i: (i, 0)),
            pl.BlockSpec((2, d), lambda i: (0, 0)),
        ],
        out_specs=pl.BlockSpec((tm, d), lambda i: (i, 0)),
        compiler_params=pltpu.CompilerParams(
            dimension_semantics=("parallel",),
            vmem_limit_bytes=_vmem_limit_bytes(),
        ),
    )(y2, params)
    return out.reshape(y.shape).astype(out_dtype)


# ----------------------------------------------------------------------------
# demo / self-test
# ----------------------------------------------------------------------------
if __name__ == "__main__":
    key = jax.random.PRNGKey(0)
    kx, kw, kb, kg, kbt, kx2, kw2 = jax.random.split(key, 7)

    eps = 1e-5
    B, S, D = 2, 128, 128          # feature dim is lane-dense (multiple of 128)

    x = jax.random.normal(kx, (B, S, D), jnp.float32)
    w = jax.random.normal(kw, (D, D), jnp.float32) / jnp.sqrt(D)
    b = 0.1 * jax.random.normal(kb, (D,), jnp.float32)
    gamma = 1.0 + 0.1 * jax.random.normal(kg, (D,), jnp.float32)
    beta = 0.1 * jax.random.normal(kbt, (D,), jnp.float32)

    # Weights are cast to bf16 ONCE at init (outside jit); activations stay in
    # their native dtype and are cast to bf16 inside the kernel before jnp.dot.
    w_bf16 = w.astype(jnp.bfloat16)

    def ln_ref(y):
        mean = y.mean(-1, keepdims=True)
        var = ((y - mean) ** 2).mean(-1, keepdims=True)
        return (y - mean) / jnp.sqrt(var + eps) * gamma + beta

    # --- fused path 1: Din == D, weight fully resident (1-D grid) -----------
    fused = jax.jit(functools.partial(post_norm_linear, eps=eps))
    out = jax.block_until_ready(fused(x, w_bf16, b, gamma, beta))
    ref = ln_ref(x @ w + b)
    assert out.shape == (B, S, D)
    # bf16 MXU operands (f32 accumulation) vs pure-f32 reference.
    assert jnp.allclose(out, ref, rtol=3e-2, atol=3e-2), (
        f"fused max abs err {jnp.max(jnp.abs(out - ref))}")

    # --- fused path 2: K-tiled Din contraction (2-D grid + f32 accumulator) --
    DIN2 = 256
    x_k = jax.random.normal(kx2, (B, S, DIN2), jnp.float32)
    w_k = jax.random.normal(kw2, (DIN2, D), jnp.float32) / jnp.sqrt(DIN2)
    w_k_bf16 = w_k.astype(jnp.bfloat16)
    fused_k = jax.jit(functools.partial(post_norm_linear, eps=eps, tk=128))
    out_k = jax.block_until_ready(fused_k(x_k, w_k_bf16, b, gamma, beta))
    ref_k = ln_ref(x_k @ w_k + b)
    assert out_k.shape == (B, S, D)
    assert jnp.allclose(out_k, ref_k, rtol=3e-2, atol=3e-2), (
        f"ktiled max abs err {jnp.max(jnp.abs(out_k - ref_k))}")

    # --- generic path: arbitrary fn (here GELU), LayerNorm-only kernel -------
    gen = jax.jit(lambda xx: post_norm(xx, jax.nn.gelu, gamma, beta, eps=eps))
    out2 = jax.block_until_ready(gen(x))
    ref2 = ln_ref(jax.nn.gelu(x))
    assert jnp.allclose(out2, ref2, rtol=1e-4, atol=1e-4), (
        f"generic max abs err {jnp.max(jnp.abs(out2 - ref2))}")

    print("KERNEL_OK")
</pallas_src>

<mosaic_0001>
module attributes {stable_mosaic.version = 11 : i64} {
  func.func @_postnorm_linear_kernel(%arg0: i32, %arg1: memref<256x128xf32, #tpu.memory_space<vmem>>, %arg2: memref<128x128xbf16, #tpu.memory_space<vmem>>, %arg3: memref<3x128xf32, #tpu.memory_space<vmem>>, %arg4: memref<256x128xf32, #tpu.memory_space<vmem>>) attributes {dimension_semantics = [#tpu.dimension_semantics<parallel>], iteration_bounds = array<i64: 1>, scalar_prefetch = 0 : i64, scratch_operands = 0 : i64, tpu.core_type = #tpu.core_type<tc>, window_params = [{transform_indices = @transform_0, window_bounds = array<i64: 256, 128>}, {pipeline_mode = #tpu.pipeline_mode<synchronous>, transform_indices = @transform_1, window_bounds = array<i64: 128, 128>}, {pipeline_mode = #tpu.pipeline_mode<synchronous>, transform_indices = @transform_2, window_bounds = array<i64: 3, 128>}, {transform_indices = @transform_3, window_bounds = array<i64: 256, 128>}]} {
    %c0 = arith.constant 0 : index
    %c0_0 = arith.constant 0 : index
    %0 = vector.load %arg1[%c0, %c0_0] : memref<256x128xf32, #tpu.memory_space<vmem>>, vector<256x128xf32>
    %1 = arith.truncf %0 : vector<256x128xf32> to vector<256x128xbf16>
    %c0_1 = arith.constant 0 : index
    %c0_2 = arith.constant 0 : index
    %2 = vector.load %arg2[%c0_1, %c0_2] : memref<128x128xbf16, #tpu.memory_space<vmem>>, vector<128x128xbf16>
    %cst = arith.constant dense<0.000000e+00> : vector<256x128xf32>
    %3 = tpu.matmul %1, %2, %cst {dimension_numbers = #tpu.dot_dimension_numbers<[1], [0], [0], [1], [0, 0, 1, 1], [], []>} : vector<256x128xbf16>, vector<128x128xbf16>, vector<256x128xf32> -> vector<256x128xf32>
    %c0_3 = arith.constant 0 : index
    %c0_4 = arith.constant 0 : index
    %4 = vector.load %arg3[%c0_3, %c0_4] : memref<3x128xf32, #tpu.memory_space<vmem>>, vector<1x128xf32>
    %5 = vector.broadcast %4 : vector<1x128xf32> to vector<256x128xf32>
    %6 = arith.addf %3, %5 : vector<256x128xf32>
    %c1 = arith.constant 1 : index
    %c0_5 = arith.constant 0 : index
    %7 = vector.load %arg3[%c1, %c0_5] : memref<3x128xf32, #tpu.memory_space<vmem>>, vector<1x128xf32>
    %c2 = arith.constant 2 : index
    %c0_6 = arith.constant 0 : index
    %8 = vector.load %arg3[%c2, %c0_6] : memref<3x128xf32, #tpu.memory_space<vmem>>, vector<1x128xf32>
    %cst_7 = arith.constant dense<0.000000e+00> : vector<256xf32>
    %9 = vector.multi_reduction <add>, %6, %cst_7 [1] : vector<256x128xf32> to vector<256xf32>
    %10 = vector.shape_cast %9 : vector<256xf32> to vector<256x1xf32>
    %cst_8 = arith.constant 1.280000e+02 : f32
    %11 = vector.broadcast %cst_8 : f32 to vector<256x1xf32>
    %12 = arith.divf %10, %11 : vector<256x1xf32>
    %13 = vector.broadcast %12 : vector<256x1xf32> to vector<256x128xf32>
    %14 = arith.subf %6, %13 : vector<256x128xf32>
    %15 = arith.mulf %14, %14 : vector<256x128xf32>
    %cst_9 = arith.constant dense<0.000000e+00> : vector<256xf32>
    %16 = vector.multi_reduction <add>, %15, %cst_9 [1] : vector<256x128xf32> to vector<256xf32>
    %17 = vector.shape_cast %16 : vector<256xf32> to vector<256x1xf32>
    %cst_10 = arith.constant 1.280000e+02 : f32
    %18 = vector.broadcast %cst_10 : f32 to vector<256x1xf32>
    %19 = arith.divf %17, %18 : vector<256x1xf32>
    %cst_11 = arith.constant 9.99999974E-6 : f32
    %20 = vector.broadcast %cst_11 : f32 to vector<256x1xf32>
    %21 = arith.addf %19, %20 : vector<256x1xf32>
    %22 = math.rsqrt %21 : vector<256x1xf32>
    %23 = vector.broadcast %22 : vector<256x1xf32> to vector<256x128xf32>
    %24 = arith.mulf %14, %23 : vector<256x128xf32>
    %25 = vector.broadcast %7 : vector<1x128xf32> to vector<256x128xf32>
    %26 = arith.mulf %24, %25 : vector<256x128xf32>
    %27 = vector.broadcast %8 : vector<1x128xf32> to vector<256x128xf32>
    %28 = arith.addf %26, %27 : vector<256x128xf32>
    %c0_12 = arith.constant 0 : index
    %c0_13 = arith.constant 0 : index
    %29 = vector.load %arg4[%c0_12, %c0_13] : memref<256x128xf32, #tpu.memory_space<vmem>>, vector<256x128xf32>
    tpu.vector_store %arg4[%c0_12, %c0_13], %28 {strides = array<i32>} : memref<256x128xf32, #tpu.memory_space<vmem>>, vector<256x128xf32>,
    return
  }
  func.func @transform_0(%arg0: i32) -> (i32, i32) {
    %c0_i32 = arith.constant 0 : i32
    %c0_i32_0 = arith.constant 0 : i32
    return %arg0, %c0_i32 : i32, i32
  }
  func.func @transform_1(%arg0: i32) -> (i32, i32) {
    %c0_i32 = arith.constant 0 : i32
    %c0_i32_0 = arith.constant 0 : i32
    %c0_i32_1 = arith.constant 0 : i32
    return %c0_i32, %c0_i32_0 : i32, i32
  }
  func.func @transform_2(%arg0: i32) -> (i32, i32) {
    %c0_i32 = arith.constant 0 : i32
    %c0_i32_0 = arith.constant 0 : i32
    %c0_i32_1 = arith.constant 0 : i32
    return %c0_i32, %c0_i32_0 : i32, i32
  }
  func.func @transform_3(%arg0: i32) -> (i32, i32) {
    %c0_i32 = arith.constant 0 : i32
    %c0_i32_0 = arith.constant 0 : i32
    return %arg0, %c0_i32 : i32, i32
  }
}

</mosaic_0001>

<bundles_post_ra>
// kernel: post_norm_linear.1
= control target key start
LH: loop header
LB: loop body
LE: loop exit
PB: predicated region body
PF: predicated region fallthrough
CT: control target
= control target key end

     0   :  { %8 = vsyncpa [#allocation3], 0  ;;  %s1517_s0 = inlined_call_operand.hbm [shape: f32[256,128], index: 0, kind: input, shape index: {}]   ;;  %s1518_s1 = inlined_call_operand.hbm [shape: bf16[128,128], index: 1, kind: input, shape index: {}]   ;;  %s1519_s2 = inlined_call_operand.vmem [shape: f32[3,128], index: 2, kind: input, shape index: {}]   ;;  %s1520_s3 = inlined_call_operand.hbm [shape: f32[256,128], index: 3, kind: output, shape index: {}]  }
   0x1   :  { %9 = vsyncpa [#allocation6], 0 }
   0x2   :  { %10 = vsyncpa [#allocation4], 0  ;;  %s1049_s12 = smov [#allocation2]   ;;  %s977_s16 = scalar_lea.hbm %s1517_s0, 4096 }
   0x3   :  { %s16_s13 = sshll.u32 %s1049_s12, 4  ;;  %p978_p0 = scmp.ne.s32.totalorder %s1517_s0, %s977_s16  ;;  %s17_s13 = int_to_ptr.vmem [resolvable:$true] %s16_s13 }
   0x4   :  { %p981_p1 = scmp.lt.u32.totalorder %s977_s16, %s1517_s0 }
   0x6   :  { %p983_p2 = pnand %p981_p1, %p978_p0 }
   0x8   :  { %986 = shalt.err (!%p983_p2)
}
   0x9   :  { %s987_s21 = scalar_lea.vmem %s17_s13, 4096  ;;  %p992_p4 = scmp.lt.s32.totalorder %s17_s13, %s17_s13 }
   0xa   :  { %p988_p3 = scmp.ne.s32.totalorder %s17_s13, %s987_s21  ;;  %p993_p5 = scmp.lt.s32.totalorder %s987_s21, %s987_s21 }
   0xc   :  { %p994_p6 = por %p993_p5, %p992_p4 }
   0xe   :  { %p995_p7 = pnand %p994_p6, %p988_p3 }
  0x10   :  { %998 = shalt.err (!%p995_p7)
}
  0x11   :  { %s1050_s22 = smov 128   ;;  %s1051_s23 = smov 8  }
  0x12   :  { %22 = dma.hbm_to_vmem [thread:$0]  %s1517_s0, 4096, %s17_s13, [#allocation3], %s1050_s22, %s1050_s22, %s1051_s23  }
  0x13   :  { %s1052_s26 = smov [#allocation5]   ;;  %s999_s30 = scalar_lea.hbm %s1518_s1, 1024 }
  0x14   :  { %s28_s27 = sshll.u32 %s1052_s26, 4  ;;  %p1000_p8 = scmp.ne.s32.totalorder %s1518_s1, %s999_s30  ;;  %s29_s27 = int_to_ptr.vmem [resolvable:$true] %s28_s27 }
  0x15   :  { %p1003_p9 = scmp.lt.u32.totalorder %s999_s30, %s1518_s1 }
  0x17   :  { %p1005_p10 = pnand %p1003_p9, %p1000_p8 }
  0x19   :  { %1008 = shalt.err (!%p1005_p10)
}
  0x1a   :  { %s1009_s8 = scalar_lea.vmem %s29_s27, 1024  ;;  %p1014_p12 = scmp.lt.s32.totalorder %s29_s27, %s29_s27 }
  0x1b   :  { %p1010_p11 = scmp.ne.s32.totalorder %s29_s27, %s1009_s8  ;;  %p1015_p13 = scmp.lt.s32.totalorder %s1009_s8, %s1009_s8 }
  0x1d   :  { %p1016_p0 = por %p1015_p13, %p1014_p12 }
  0x1f   :  { %p1017_p1 = pnand %p1016_p0, %p1010_p11 }
  0x21   :  { %1020 = shalt.err (!%p1017_p1)
}
  0x22   :  { %s1053_s0 = smov 64   ;;  %s1054_s9 = smov 4  }
  0x23   :  { %34 = dma.hbm_to_vmem [thread:$0]  %s1518_s1, 1024, %s29_s27, [#allocation6], %s1053_s0, %s1053_s0, %s1054_s9  }
  0x24   :  { %1043 = dma.done.wait [#allocation3], 4096  }
  0x25   :  { %1044 = vsyncadd [#allocation3], 4294963200 }
  0x26   :  { %1045 = dma.done.wait [#allocation6], 1024  }
  0x27   :  { %1046 = vsyncadd [#allocation6], 4294966272  ;;  %v905_v0 = vld [vmem:[#allocation5] sm:$0xff]   ;;  %v906_v1 = vld [vmem:[#allocation5 + $0x8] sm:$0xff]  }
  0x28   :  { %834 = vmatprep.subr.bf16.mxu0 %v905_v0  ;;  %882 = vmatprep.subr.bf16.mxu1 %v905_v0  ;;  %v907_v2 = vld [vmem:[#allocation5 + $0x10] sm:$0xff]   ;;  %v908_v3 = vld [vmem:[#allocation5 + $0x18] sm:$0xff]   ;;  %v44_v4 = vld [vmem:[#allocation2] sm:$0xff] }
  0x29   :  { %835 = vmatpush3.bf16.msra.mxu0 %v905_v0  ;;  %890 = vmatpush3.bf16.msra.mxu1 %v905_v0  ;;  %v45_v5 = vld [vmem:[#allocation2 + $0x8] sm:$0xff]  ;;  %v60_v6 = vld [vmem:[#allocation2 + $0x80] sm:$0xff]  ;;  %v911_v12 = vld [vmem:[#allocation5 + $0x30] sm:$0xff]  }
  0x2a   :  { %836 = vmatprep.subr.bf16.mxu0 %v906_v1  ;;  %883 = vmatprep.subr.bf16.mxu1 %v906_v1  ;;  %v76_v7 = vpack.c.bf16 %v45_v5, %v44_v4  ;;  %v61_v8 = vld [vmem:[#allocation2 + $0x88] sm:$0xff]  ;;  %v909_v10 = vld [vmem:[#allocation5 + $0x20] sm:$0xff]   ;;  %v912_v13 = vld [vmem:[#allocation5 + $0x38] sm:$0xff]  }
  0x2b   :  { %v84_v9 = vpack.c.bf16 %v61_v8, %v60_v6  ;;  %v910_v11 = vld [vmem:[#allocation5 + $0x28] sm:$0xff]   ;;  %v46_v14 = vld [vmem:[#allocation2 + $0x10] sm:$0xff]  ;;  %v47_v15 = vld [vmem:[#allocation2 + $0x18] sm:$0xff] }
  0x2c   :  { %850 = vmatprep.mubr.bf16.mxu0 %v76_v7  ;;  %v62_v16 = vld [vmem:[#allocation2 + $0x90] sm:$0xff]  ;;  %v63_v17 = vld [vmem:[#allocation2 + $0x98] sm:$0xff]  ;;  %v48_v18 = vld [vmem:[#allocation2 + $0x20] sm:$0xff]  ;;  %v77_v22 = vpack.c.bf16 %v47_v15, %v46_v14 }
  0x2d   :  { %837 = vmatpush3.bf16.msra.mxu0 %v906_v1  ;;  %891 = vmatpush3.bf16.msra.mxu1 %v906_v1  ;;  %v49_v19 = vld [vmem:[#allocation2 + $0x28] sm:$0xff]  ;;  %v64_v20 = vld [vmem:[#allocation2 + $0xa0] sm:$0xff]  ;;  %v85_v23 = vpack.c.bf16 %v63_v17, %v62_v16  ;;  %v50_v26 = vld [vmem:[#allocation2 + $0x30] sm:$0xff] }
  0x2e   :  { %838 = vmatprep.subr.bf16.mxu0 %v907_v2  ;;  %884 = vmatprep.subr.bf16.mxu1 %v907_v2  ;;  %v65_v21 = vld [vmem:[#allocation2 + $0xa8] sm:$0xff]  ;;  %v78_v24 = vpack.c.bf16 %v49_v19, %v48_v18  ;;  %v51_v27 = vld [vmem:[#allocation2 + $0x38] sm:$0xff]  ;;  %v66_v28 = vld [vmem:[#allocation2 + $0xb0] sm:$0xff] }
  0x2f   :  { %866 = vmatprep.mubr.bf16.mxu1 %v84_v9  ;;  %v86_v25 = vpack.c.bf16 %v65_v21, %v64_v20  ;;  %v67_v29 = vld [vmem:[#allocation2 + $0xb8] sm:$0xff]  ;;  %v52_v30 = vld [vmem:[#allocation2 + $0x40] sm:$0xff]  ;;  %v53_v31 = vld [vmem:[#allocation2 + $0x48] sm:$0xff]  ;;  %v79_v34 = vpack.c.bf16 %v51_v27, %v50_v26 }
  0x30   :  { %v68_v32 = vld [vmem:[#allocation2 + $0xc0] sm:$0xff]  ;;  %v69_v33 = vld [vmem:[#allocation2 + $0xc8] sm:$0xff]  ;;  %v87_v35 = vpack.c.bf16 %v67_v29, %v66_v28  ;;  %v80_v36 = vpack.c.bf16 %v53_v31, %v52_v30  ;;  %v54_v38 = vld [vmem:[#allocation2 + $0x50] sm:$0xff] }
  0x31   :  { %839 = vmatpush3.bf16.msra.mxu0 %v907_v2  ;;  %892 = vmatpush3.bf16.msra.mxu1 %v907_v2  ;;  %v88_v37 = vpack.c.bf16 %v69_v33, %v68_v32  ;;  %v55_v39 = vld [vmem:[#allocation2 + $0x58] sm:$0xff]  ;;  %v70_v40 = vld [vmem:[#allocation2 + $0xd0] sm:$0xff]  ;;  %v56_v42 = vld [vmem:[#allocation2 + $0x60] sm:$0xff] }
  0x32   :  { %840 = vmatprep.subr.bf16.mxu0 %v908_v3  ;;  %885 = vmatprep.subr.bf16.mxu1 %v908_v3  ;;  %v71_v41 = vld [vmem:[#allocation2 + $0xd8] sm:$0xff]  ;;  %v57_v43 = vld [vmem:[#allocation2 + $0x68] sm:$0xff]  ;;  %v72_v44 = vld [vmem:[#allocation2 + $0xe0] sm:$0xff]  ;;  %v81_v46 = vpack.c.bf16 %v55_v39, %v54_v38 }
  0x33   :  { %v73_v45 = vld [vmem:[#allocation2 + $0xe8] sm:$0xff]  ;;  %v89_v47 = vpack.c.bf16 %v71_v41, %v70_v40  ;;  %v82_v48 = vpack.c.bf16 %v57_v43, %v56_v42  ;;  %v58_v50 = vld [vmem:[#allocation2 + $0x70] sm:$0xff]  ;;  %v59_v51 = vld [vmem:[#allocation2 + $0x78] sm:$0xff] }
  0x34   :  { %v90_v49 = vpack.c.bf16 %v73_v45, %v72_v44  ;;  %v74_v52 = vld [vmem:[#allocation2 + $0xf0] sm:$0xff]  ;;  %v75_v53 = vld [vmem:[#allocation2 + $0xf8] sm:$0xff]  ;;  %v83_v54 = vpack.c.bf16 %v59_v51, %v58_v50  ;;  %v1106_v56 = vld [vmem:[%s1519_s2] ss:$0 sm:$0xff] }
  0x35   :  { %841 = vmatpush3.bf16.msra.mxu0 %v908_v3  ;;  %893 = vmatpush3.bf16.msra.mxu1 %v908_v3  ;;  %v91_v55 = vpack.c.bf16 %v75_v53, %v74_v52 }
  0x36   :  { %842 = vmatprep.subr.bf16.mxu0 %v909_v10  ;;  %886 = vmatprep.subr.bf16.mxu1 %v909_v10 }
  0x39   :  { %843 = vmatpush3.bf16.msra.mxu0 %v909_v10  ;;  %894 = vmatpush3.bf16.msra.mxu1 %v909_v10 }
  0x3a   :  { %844 = vmatprep.subr.bf16.mxu0 %v910_v11  ;;  %887 = vmatprep.subr.bf16.mxu1 %v910_v11 }
  0x3d   :  { %845 = vmatpush3.bf16.msra.mxu0 %v910_v11  ;;  %895 = vmatpush3.bf16.msra.mxu1 %v910_v11 }
  0x3e   :  { %846 = vmatprep.subr.bf16.mxu0 %v911_v12  ;;  %888 = vmatprep.subr.bf16.mxu1 %v911_v12 }
  0x41   :  { %847 = vmatpush3.bf16.msra.mxu0 %v911_v12  ;;  %896 = vmatpush3.bf16.msra.mxu1 %v911_v12 }
  0x42   :  { %848 = vmatprep.subr.bf16.mxu0 %v912_v13  ;;  %889 = vmatprep.subr.bf16.mxu1 %v912_v13 }
  0x45   :  { %849 = vmatpush3.bf16.msra.mxu0 %v912_v13  ;;  %897 = vmatpush3.bf16.msra.mxu1 %v912_v13 }
  0x48   :  { %851 = vmatmul.mubr.bf16.vlgmr.msra.gmra.mrb[0].mxu0 %v77_v22  ;;  %867 = vmatmul.mubr.bf16.vlgmr.msra.gmra.mrb[0].mxu1 %v85_v23 }
  0x49   :  { %854 = vmatprep.mubr.bf16.mxu0 %v78_v24  ;;  %870 = vmatprep.mubr.bf16.mxu1 %v86_v25 }
  0x50   :  { %855 = vmatmul.mubr.bf16.gmra.mrb[4].mxu0 %v79_v34  ;;  %871 = vmatmul.mubr.bf16.gmra.mrb[4].mxu1 %v87_v35 }
  0x51   :  { %858 = vmatprep.mubr.bf16.mxu0 %v80_v36  ;;  %874 = vmatprep.mubr.bf16.mxu1 %v88_v37 }
  0x58   :  { %859 = vmatmul.mubr.bf16.gmra.mrb[8].mxu0 %v81_v46  ;;  %875 = vmatmul.mubr.bf16.gmra.mrb[8].mxu1 %v89_v47 }
  0x59   :  { %862 = vmatprep.mubr.bf16.mxu0 %v82_v48  ;;  %878 = vmatprep.mubr.bf16.mxu1 %v90_v49 }
  0x60   :  { %863 = vmatmul.mubr.bf16.gmra.mrb[12].mxu0 %v83_v54  ;;  %879 = vmatmul.mubr.bf16.gmra.mrb[12].mxu1 %v91_v55 }
 0x11b   :  { %v852_v57 = vpop.f32.mrb[0].mxu0  ;;  %v868_v58 = vpop.f32.mrb[0].mxu1 }
 0x11c   :  { %v1109_v59 = vadd.f32 %v852_v57, %v1106_v56  ;;  %v1112_v60 = vadd.f32 %v868_v58, %v1106_v56  ;;  %v195_v61 = vpop.f32.mrb[1].mxu0  ;;  %v259_v62 = vpop.f32.mrb[1].mxu1 }
 0x11d   :  { %v853_v63 = vpop.f32.mrb[2].mxu0  ;;  %v869_v0 = vpop.f32.mrb[2].mxu1  ;;  %v1117_v3 = vadd.f32 %v1106_v56, %v195_v61  ;;  %v1125_v7 = vadd.f32 %v1106_v56, %v259_v62 }
 0x11e   :  { %360 = vadd.xlane.f32.xlu0 %v1112_v60  ;;  %v262_v1 = vpop.f32.mrb[3].mxu1  ;;  %328 = vadd.xlane.f32.xlu1 %v1109_v59  ;;  %v198_v2 = vpop.f32.mrb[3].mxu0  ;;  %v1120_v4 = vadd.f32 %v853_v63, %v1106_v56  ;;  %v1128_v8 = vadd.f32 %v869_v0, %v1106_v56 }
 0x11f   :  { %v1133_v15 = vadd.f32 %v1106_v56, %v262_v1  ;;  %v1136_v16 = vadd.f32 %v1106_v56, %v198_v2 }
 0x122   :  { %330 = vadd.xlane.f32.xlu1 %v1120_v4  ;;  %324 = vadd.xlane.f32.xlu0 %v1117_v3 }
 0x123   :  { %v856_v5 = vpop.f32.mrb[4].mxu0  ;;  %v872_v6 = vpop.f32.mrb[4].mxu1 }
 0x124   :  { %v211_v9 = vpop.f32.mrb[5].mxu0  ;;  %v275_v10 = vpop.f32.mrb[5].mxu1  ;;  %v1139_v17 = vadd.f32 %v856_v5, %v1106_v56  ;;  %v1147_v25 = vadd.f32 %v872_v6, %v1106_v56 }
 0x125   :  { %v857_v11 = vpop.f32.mrb[6].mxu0  ;;  %v873_v12 = vpop.f32.mrb[6].mxu1  ;;  %v1157_v31 = vadd.f32 %v1106_v56, %v211_v9  ;;  %v1165_v39 = vadd.f32 %v1106_v56, %v275_v10 }
 0x126   :  { %362 = vadd.xlane.f32.xlu1 %v1128_v8  ;;  %356 = vadd.xlane.f32.xlu0 %v1125_v7  ;;  %v214_v13 = vpop.f32.mrb[7].mxu0  ;;  %v278_v14 = vpop.f32.mrb[7].mxu1  ;;  %v1144_v18 = vadd.f32 %v857_v11, %v1106_v56  ;;  %v1152_v26 = vadd.f32 %v873_v12, %v1106_v56 }
 0x127   :  { %v1160_v32 = vadd.f32 %v1106_v56, %v214_v13  ;;  %v1168_v40 = vadd.f32 %v1106_v56, %v278_v14 }
 0x12a   :  { %358 = vadd.xlane.f32.xlu1 %v1133_v15  ;;  %326 = vadd.xlane.f32.xlu0 %v1136_v16 }
 0x12b   :  { %v860_v19 = vpop.f32.mrb[8].mxu0  ;;  %v876_v20 = vpop.f32.mrb[8].mxu1 }
 0x12c   :  { %v227_v21 = vpop.f32.mrb[9].mxu0  ;;  %v291_v22 = vpop.f32.mrb[9].mxu1  ;;  %v1171_v41 = vadd.f32 %v860_v19, %v1106_v56  ;;  %v1179_v43 = vadd.f32 %v876_v20, %v1106_v56 }
 0x12d   :  { %v861_v23 = vpop.f32.mrb[10].mxu0  ;;  %v877_v24 = vpop.f32.mrb[10].mxu1  ;;  %v1189_v45 = vadd.f32 %v1106_v56, %v227_v21  ;;  %v1197_v47 = vadd.f32 %v1106_v56, %v291_v22 }
 0x12e   :  { %338 = vadd.xlane.f32.xlu1 %v1144_v18  ;;  %336 = vadd.xlane.f32.xlu0 %v1139_v17  ;;  %v230_v27 = vpop.f32.mrb[11].mxu0  ;;  %v294_v28 = vpop.f32.mrb[11].mxu1  ;;  %v1176_v42 = vadd.f32 %v861_v23, %v1106_v56  ;;  %v1184_v44 = vadd.f32 %v877_v24, %v1106_v56 }
 0x12f   :  { %v1192_v46 = vadd.f32 %v1106_v56, %v230_v27  ;;  %v1200_v48 = vadd.f32 %v1106_v56, %v294_v28 }
 0x132   :  { %370 = vadd.xlane.f32.xlu1 %v1152_v26  ;;  %368 = vadd.xlane.f32.xlu0 %v1147_v25 }
 0x133   :  { %v864_v29 = vpop.f32.mrb[12].mxu0  ;;  %v880_v30 = vpop.f32.mrb[12].mxu1 }
 0x134   :  { %v243_v33 = vpop.f32.mrb[13].mxu0  ;;  %v307_v34 = vpop.f32.mrb[13].mxu1  ;;  %v1203_v49 = vadd.f32 %v864_v29, %v1106_v56  ;;  %v1229_v55 = vadd.f32 %v880_v30, %v1106_v56 }
 0x135   :  { %v865_v35 = vpop.f32.mrb[14].mxu0  ;;  %v881_v36 = vpop.f32.mrb[14].mxu1  ;;  %v1213_v51 = vadd.f32 %v1106_v56, %v243_v33  ;;  %v1219_v53 = vadd.f32 %v1106_v56, %v307_v34 }
 0x136   :  { %334 = vadd.xlane.f32.xlu1 %v1160_v32  ;;  %332 = vadd.xlane.f32.xlu0 %v1157_v31  ;;  %v246_v37 = vpop.f32.mrb[15].mxu0  ;;  %v310_v38 = vpop.f32.mrb[15].mxu1  ;;  %v1208_v50 = vadd.f32 %v865_v35, %v1106_v56  ;;  %v1232_v57 = vadd.f32 %v881_v36, %v1106_v56 }
 0x137   :  { %v1216_v52 = vadd.f32 %v1106_v56, %v246_v37  ;;  %v1224_v54 = vadd.f32 %v1106_v56, %v310_v38 }
 0x13a   :  { %366 = vadd.xlane.f32.xlu1 %v1168_v40  ;;  %364 = vadd.xlane.f32.xlu0 %v1165_v39 }
 0x13e   :  { %346 = vadd.xlane.f32.xlu1 %v1176_v42  ;;  %344 = vadd.xlane.f32.xlu0 %v1171_v41 }
 0x142   :  { %378 = vadd.xlane.f32.xlu1 %v1184_v44  ;;  %376 = vadd.xlane.f32.xlu0 %v1179_v43 }
 0x146   :  { %342 = vadd.xlane.f32.xlu1 %v1192_v46  ;;  %340 = vadd.xlane.f32.xlu0 %v1189_v45 }
 0x14a   :  { %374 = vadd.xlane.f32.xlu1 %v1200_v48  ;;  %372 = vadd.xlane.f32.xlu0 %v1197_v47 }
 0x14e   :  { %354 = vadd.xlane.f32.xlu1 %v1208_v50  ;;  %352 = vadd.xlane.f32.xlu0 %v1203_v49 }
 0x152   :  { %350 = vadd.xlane.f32.xlu1 %v1216_v52  ;;  %348 = vadd.xlane.f32.xlu0 %v1213_v51 }
 0x156   :  { %382 = vadd.xlane.f32.xlu1 %v1224_v54  ;;  %380 = vadd.xlane.f32.xlu0 %v1219_v53 }
 0x15a   :  { %386 = vadd.xlane.f32.xlu1 %v1232_v57  ;;  %384 = vadd.xlane.f32.xlu0 %v1229_v55 }
 0x1ab   :  { %v361_v58 = vpop.xlane.xlu0 %360  ;;  %v329_v61 = vpop.xlane.xlu1 %328 }
 0x1ac   :  { %v407_v62 = vmul.f32 0.0078125, %v361_v58  ;;  %v391_v63 = vmul.f32 0.0078125, %v329_v61 }
 0x1ae   :  { %v1237_v0 = vsub.f32 %v1109_v59, %v391_v63  ;;  %v1240_v5 = vsub.f32 %v1112_v60, %v407_v62 }
 0x1af   :  { %v331_v1 = vpop.xlane.xlu1 %330  ;;  %v325_v2 = vpop.xlane.xlu0 %324 }
 0x1b0   :  { %v392_v6 = vmul.f32 0.0078125, %v331_v1  ;;  %v389_v9 = vmul.f32 0.0078125, %v325_v2  ;;  %v455_v56 = vmul.f32 %v1237_v0, %v1237_v0  ;;  %v471_v19 = vmul.f32 %v1240_v5, %v1240_v5 }
 0x1b2   :  { %v1245_v10 = vsub.f32 %v1120_v4, %v392_v6  ;;  %489 = vadd.xlane.f32.xlu0 %v455_v56  ;;  %v1248_v11 = vsub.f32 %v1117_v3, %v389_v9 }
 0x1b3   :  { %v363_v12 = vpop.xlane.xlu1 %362  ;;  %v357_v59 = vpop.xlane.xlu0 %356 }
 0x1b4   :  { %v408_v13 = vmul.f32 0.0078125, %v363_v12  ;;  %v405_v14 = vmul.f32 0.0078125, %v357_v59  ;;  %v456_v60 = vmul.f32 %v1245_v10, %v1245_v10  ;;  %v453_v3 = vmul.f32 %v1248_v11, %v1248_v11 }
 0x1b6   :  { %v1255_v20 = vsub.f32 %v1128_v8, %v408_v13  ;;  %491 = vadd.xlane.f32.xlu1 %v456_v60  ;;  %521 = vadd.xlane.f32.xlu0 %v471_v19  ;;  %v1260_v22 = vsub.f32 %v1125_v7, %v405_v14 }
 0x1b7   :  { %v359_v4 = vpop.xlane.xlu1 %358  ;;  %v327_v21 = vpop.xlane.xlu0 %326 }
 0x1b8   :  { %v406_v23 = vmul.f32 0.0078125, %v359_v4  ;;  %v390_v24 = vmul.f32 0.0078125, %v327_v21  ;;  %v472_v27 = vmul.f32 %v1255_v20, %v1255_v20  ;;  %v469_v7 = vmul.f32 %v1260_v22, %v1260_v22 }
 0x1ba   :  { %v1265_v28 = vsub.f32 %v1136_v16, %v390_v24  ;;  %523 = vadd.xlane.f32.xlu1 %v472_v27  ;;  %485 = vadd.xlane.f32.xlu0 %v453_v3  ;;  %v1268_v8 = vsub.f32 %v1133_v15, %v406_v23 }
 0x1bb   :  { %v339_v29 = vpop.xlane.xlu1 %338  ;;  %v337_v30 = vpop.xlane.xlu0 %336 }
 0x1bc   :  { %v396_v33 = vmul.f32 0.0078125, %v339_v29  ;;  %v395_v34 = vmul.f32 0.0078125, %v337_v30  ;;  %v454_v35 = vmul.f32 %v1265_v28, %v1265_v28  ;;  %v470_v15 = vmul.f32 %v1268_v8, %v1268_v8 }
 0x1be   :  { %v1275_v36 = vsub.f32 %v1139_v17, %v395_v34  ;;  %517 = vadd.xlane.f32.xlu0 %v469_v7  ;;  %487 = vadd.xlane.f32.xlu1 %v454_v35  ;;  %v1280_v38 = vsub.f32 %v1144_v18, %v396_v33 }
 0x1bf   :  { %v371_v16 = vpop.xlane.xlu1 %370  ;;  %v369_v37 = vpop.xlane.xlu0 %368 }
 0x1c0   :  { %v412_v58 = vmul.f32 0.0078125, %v371_v16  ;;  %v411_v61 = vmul.f32 0.0078125, %v369_v37  ;;  %v459_v62 = vmul.f32 %v1275_v36, %v1275_v36  ;;  %v460_v18 = vmul.f32 %v1280_v38, %v1280_v38 }
 0x1c2   :  { %v1285_v63 = vsub.f32 %v1147_v25, %v411_v61  ;;  %519 = vadd.xlane.f32.xlu1 %v470_v15  ;;  %497 = vadd.xlane.f32.xlu0 %v459_v62  ;;  %v1288_v17 = vsub.f32 %v1152_v26, %v412_v58 }
 0x1c3   :  { %v335_v1 = vpop.xlane.xlu1 %334  ;;  %v333_v2 = vpop.xlane.xlu0 %332 }
 0x1c4   :  { %v394_v6 = vmul.f32 0.0078125, %v335_v1  ;;  %v393_v9 = vmul.f32 0.0078125, %v333_v2  ;;  %v475_v56 = vmul.f32 %v1285_v63, %v1285_v63  ;;  %v476_v26 = vmul.f32 %v1288_v17, %v1288_v17 }
 0x1c6   :  { %v1295_v12 = vsub.f32 %v1157_v31, %v393_v9  ;;  %499 = vadd.xlane.f32.xlu1 %v460_v18  ;;  %529 = vadd.xlane.f32.xlu0 %v475_v56  ;;  %v1300_v13 = vsub.f32 %v1160_v32, %v394_v6 }
 0x1c7   :  { %v367_v25 = vpop.xlane.xlu1 %366  ;;  %v365_v59 = vpop.xlane.xlu0 %364 }
 0x1c8   :  { %v410_v14 = vmul.f32 0.0078125, %v367_v25  ;;  %v409_v60 = vmul.f32 0.0078125, %v365_v59  ;;  %v457_v19 = vmul.f32 %v1295_v12, %v1295_v12  ;;  %v458_v32 = vmul.f32 %v1300_v13, %v1300_v13 }
 0x1ca   :  { %v1305_v4 = vsub.f32 %v1165_v39, %v409_v60  ;;  %531 = vadd.xlane.f32.xlu1 %v476_v26  ;;  %493 = vadd.xlane.f32.xlu0 %v457_v19  ;;  %v1308_v31 = vsub.f32 %v1168_v40, %v410_v14 }
 0x1cb   :  { %v347_v21 = vpop.xlane.xlu1 %346  ;;  %v345_v3 = vpop.xlane.xlu0 %344 }
 0x1cc   :  { %v400_v23 = vmul.f32 0.0078125, %v347_v21  ;;  %v399_v24 = vmul.f32 0.0078125, %v345_v3  ;;  %v473_v27 = vmul.f32 %v1305_v4, %v1305_v4  ;;  %v474_v40 = vmul.f32 %v1308_v31, %v1308_v31 }
 0x1ce   :  { %v1315_v29 = vsub.f32 %v1171_v41, %v399_v24  ;;  %495 = vadd.xlane.f32.xlu1 %v458_v32  ;;  %525 = vadd.xlane.f32.xlu0 %v473_v27  ;;  %v1320_v33 = vsub.f32 %v1176_v42, %v400_v23 }
 0x1cf   :  { %v379_v39 = vpop.xlane.xlu1 %378  ;;  %v377_v30 = vpop.xlane.xlu0 %376 }
 0x1d0   :  { %v416_v34 = vmul.f32 0.0078125, %v379_v39  ;;  %v415_v7 = vmul.f32 0.0078125, %v377_v30  ;;  %v463_v35 = vmul.f32 %v1315_v29, %v1315_v29  ;;  %v464_v42 = vmul.f32 %v1320_v33, %v1320_v33 }
 0x1d2   :  { %v1325_v16 = vsub.f32 %v1179_v43, %v415_v7  ;;  %527 = vadd.xlane.f32.xlu1 %v474_v40  ;;  %505 = vadd.xlane.f32.xlu0 %v463_v35  ;;  %v1328_v41 = vsub.f32 %v1184_v44, %v416_v34 }
 0x1d3   :  { %v343_v37 = vpop.xlane.xlu1 %342  ;;  %v341_v15 = vpop.xlane.xlu0 %340 }
 0x1d4   :  { %v398_v58 = vmul.f32 0.0078125, %v343_v37  ;;  %v397_v61 = vmul.f32 0.0078125, %v341_v15  ;;  %v479_v62 = vmul.f32 %v1325_v16, %v1325_v16  ;;  %v480_v44 = vmul.f32 %v1328_v41, %v1328_v41 }
 0x1d6   :  { %v1335_v1 = vsub.f32 %v1189_v45, %v397_v61  ;;  %507 = vadd.xlane.f32.xlu1 %v464_v42  ;;  %537 = vadd.xlane.f32.xlu0 %v479_v62  ;;  %v1340_v6 = vsub.f32 %v1192_v46, %v398_v58 }
 0x1d7   :  { %v375_v43 = vpop.xlane.xlu1 %374  ;;  %v373_v2 = vpop.xlane.xlu0 %372 }
 0x1d8   :  { %v414_v9 = vmul.f32 0.0078125, %v375_v43  ;;  %v413_v18 = vmul.f32 0.0078125, %v373_v2  ;;  %v461_v56 = vmul.f32 %v1335_v1, %v1335_v1  ;;  %v462_v46 = vmul.f32 %v1340_v6, %v1340_v6 }
 0x1da   :  { %v1345_v25 = vsub.f32 %v1197_v47, %v413_v18  ;;  %539 = vadd.xlane.f32.xlu1 %v480_v44  ;;  %501 = vadd.xlane.f32.xlu0 %v461_v56  ;;  %v1348_v45 = vsub.f32 %v1200_v48, %v414_v9 }
 0x1db   :  { %v355_v59 = vpop.xlane.xlu1 %354  ;;  %v353_v26 = vpop.xlane.xlu0 %352 }
 0x1dc   :  { %v404_v14 = vmul.f32 0.0078125, %v355_v59  ;;  %v403_v60 = vmul.f32 0.0078125, %v353_v26  ;;  %v477_v19 = vmul.f32 %v1345_v25, %v1345_v25  ;;  %v478_v48 = vmul.f32 %v1348_v45, %v1348_v45 }
 0x1de   :  { %v1355_v21 = vsub.f32 %v1203_v49, %v403_v60  ;;  %503 = vadd.xlane.f32.xlu1 %v462_v46  ;;  %533 = vadd.xlane.f32.xlu0 %v477_v19  ;;  %v1360_v23 = vsub.f32 %v1208_v50, %v404_v14 }
 0x1df   :  { %v351_v47 = vpop.xlane.xlu1 %350  ;;  %v349_v3 = vpop.xlane.xlu0 %348 }
 0x1e0   :  { %v402_v24 = vmul.f32 0.0078125, %v351_v47  ;;  %v401_v32 = vmul.f32 0.0078125, %v349_v3  ;;  %v467_v27 = vmul.f32 %v1355_v21, %v1355_v21  ;;  %v468_v50 = vmul.f32 %v1360_v23, %v1360_v23 }
 0x1e2   :  { %v1365_v39 = vsub.f32 %v1213_v51, %v401_v32  ;;  %535 = vadd.xlane.f32.xlu1 %v478_v48  ;;  %513 = vadd.xlane.f32.xlu0 %v467_v27  ;;  %v1368_v49 = vsub.f32 %v1216_v52, %v402_v24 }
 0x1e3   :  { %v383_v30 = vpop.xlane.xlu1 %382  ;;  %v381_v40 = vpop.xlane.xlu0 %380 }
 0x1e4   :  { %v418_v34 = vmul.f32 0.0078125, %v383_v30  ;;  %v417_v7 = vmul.f32 0.0078125, %v381_v40  ;;  %v465_v35 = vmul.f32 %v1365_v39, %v1365_v39  ;;  %v466_v52 = vmul.f32 %v1368_v49, %v1368_v49 }
 0x1e6   :  { %v1375_v37 = vsub.f32 %v1219_v53, %v417_v7  ;;  %515 = vadd.xlane.f32.xlu1 %v468_v50  ;;  %509 = vadd.xlane.f32.xlu0 %v465_v35  ;;  %v1380_v58 = vsub.f32 %v1224_v54, %v418_v34  ;;  %v1399_v7 = vld [vmem:[%s1519_s2 + $0x1] ss:$0 sm:$0xff] }
 0x1e7   :  { %v387_v51 = vpop.xlane.xlu1 %386  ;;  %v385_v15 = vpop.xlane.xlu0 %384 }
 0x1e8   :  { %v420_v61 = vmul.f32 0.0078125, %v387_v51  ;;  %v419_v42 = vmul.f32 0.0078125, %v385_v15  ;;  %v481_v62 = vmul.f32 %v1375_v37, %v1375_v37  ;;  %v482_v2 = vmul.f32 %v1380_v58, %v1380_v58 }
 0x1ea   :  { %v1385_v43 = vsub.f32 %v1229_v55, %v419_v42  ;;  %511 = vadd.xlane.f32.xlu1 %v466_v52  ;;  %541 = vadd.xlane.f32.xlu0 %v481_v62  ;;  %v1388_v53 = vsub.f32 %v1232_v57, %v420_v61  ;;  %v1405_v61 = vld [vmem:[%s1519_s2 + $0x2] ss:$0 sm:$0xff]  ;;  %s1055_s2 = smov [#allocation7]  }
 0x1eb   :  { %s786_s17 = sshll.u32 %s1055_s2, 4  ;;  %s787_s17 = int_to_ptr.vmem [resolvable:$true] %s786_s17 }
 0x1ec   :  { %v483_v54 = vmul.f32 %v1385_v43, %v1385_v43  ;;  %v484_v44 = vmul.f32 %v1388_v53, %v1388_v53  ;;  %s1021_s18 = scalar_lea.vmem %s787_s17, 4096  ;;  %p1026_p3 = scmp.lt.s32.totalorder %s787_s17, %s787_s17 }
 0x1ed   :  { %p1022_p2 = scmp.ne.s32.totalorder %s787_s17, %s1021_s18  ;;  %p1027_p4 = scmp.lt.s32.totalorder %s1021_s18, %s1021_s18 }
 0x1ee   :  { %543 = vadd.xlane.f32.xlu1 %v482_v2  ;;  %545 = vadd.xlane.f32.xlu0 %v483_v54 }
 0x1ef   :  { %p1028_p5 = por %p1027_p4, %p1026_p3 }
 0x1f1   :  { %p1029_p6 = pnand %p1028_p5, %p1022_p2 }
 0x1f2   :  { %547 = vadd.xlane.f32.xlu1 %v484_v44 }
 0x23f   :  { %v490_v9 = vpop.xlane.xlu0 %489 }
 0x240   :  { %v551_v55 = vmul.f32 0.0078125, %v490_v9 }
 0x242   :  { %v583_v18 = vadd.f32 1e-05, %v551_v55 }
 0x243   :  { %v492_v56 = vpop.xlane.xlu1 %491  ;;  %v522_v59 = vpop.xlane.xlu0 %521 }
 0x244   :  { %913 = vrsqrt.f32 %v583_v18  ;;  %v552_v57 = vmul.f32 0.0078125, %v492_v56  ;;  %v567_v26 = vmul.f32 0.0078125, %v522_v59 }
 0x246   :  { %v584_v14 = vadd.f32 1e-05, %v552_v57  ;;  %v599_v60 = vadd.f32 1e-05, %v567_v26 }
 0x247   :  { %v524_v46 = vpop.xlane.xlu1 %523  ;;  %v486_v19 = vpop.xlane.xlu0 %485 }
 0x248   :  { %915 = vrsqrt.f32 %v584_v14  ;;  %v568_v47 = vmul.f32 0.0078125, %v524_v46  ;;  %v549_v3 = vmul.f32 0.0078125, %v486_v19 }
 0x249   :  { %917 = vrsqrt.f32 %v599_v60 }
 0x24a   :  { %v600_v48 = vadd.f32 1e-05, %v568_v47  ;;  %v581_v24 = vadd.f32 1e-05, %v549_v3 }
 0x24b   :  { %v488_v32 = vpop.xlane.xlu1 %487  ;;  %v518_v27 = vpop.xlane.xlu0 %517 }
 0x24c   :  { %919 = vrsqrt.f32 %v600_v48  ;;  %v550_v30 = vmul.f32 0.0078125, %v488_v32  ;;  %v565_v40 = vmul.f32 0.0078125, %v518_v27 }
 0x24d   :  { %921 = vrsqrt.f32 %v581_v24 }
 0x24e   :  { %v914_v34 = vpop.eup %913  ;;  %v582_v50 = vadd.f32 1e-05, %v550_v30  ;;  %v597_v35 = vadd.f32 1e-05, %v565_v40 }
 0x24f   :  { %v647_v51 = vmul.f32 %v914_v34, %v1237_v0  ;;  %v520_v15 = vpop.xlane.xlu1 %519  ;;  %v498_v52 = vpop.xlane.xlu0 %497 }
 0x250   :  { %923 = vrsqrt.f32 %v582_v50  ;;  %v566_v42 = vmul.f32 0.0078125, %v520_v15  ;;  %v555_v62 = vmul.f32 0.0078125, %v498_v52 }
 0x251   :  { %v683_v2 = vmul.f32 %v1399_v7, %v647_v51  ;;  %925 = vrsqrt.f32 %v597_v35 }
 0x252   :  { %v916_v54 = vpop.eup %915  ;;  %v598_v44 = vadd.f32 1e-05, %v566_v42  ;;  %v587_v9 = vadd.f32 1e-05, %v555_v62 }
 0x253   :  { %v918_v55 = vpop.eup %917  ;;  %v719_v18 = vadd.f32 %v1405_v61, %v683_v2  ;;  %v648_v0 = vmul.f32 %v916_v54, %v1245_v10  ;;  %v500_v56 = vpop.xlane.xlu1 %499 }
 0x254   :  { %v530_v59 = vpop.xlane.xlu0 %529  ;;  %v663_v57 = vmul.f32 %v918_v55, %v1240_v5  ;;  %927 = vrsqrt.f32 %v598_v44  ;;  %v556_v26 = vmul.f32 0.0078125, %v500_v56 }
 0x255   :  { %v571_v14 = vmul.f32 0.0078125, %v530_v59  ;;  %751 = vst [vmem:[#allocation7 + $0x10] sm:$0xff] %v719_v18  ;;  %v684_v60 = vmul.f32 %v1399_v7, %v648_v0  ;;  %929 = vrsqrt.f32 %v587_v9 }
 0x256   :  { %v920_v46 = vpop.eup %919  ;;  %v699_v19 = vmul.f32 %v1399_v7, %v663_v57  ;;  %v588_v47 = vadd.f32 1e-05, %v556_v26 }
 0x257   :  { %v603_v3 = vadd.f32 1e-05, %v571_v14  ;;  %v922_v48 = vpop.eup %921  ;;  %v720_v24 = vadd.f32 %v1405_v61, %v684_v60  ;;  %v664_v10 = vmul.f32 %v920_v46, %v1255_v20  ;;  %v532_v32 = vpop.xlane.xlu1 %531 }
 0x258   :  { %v494_v27 = vpop.xlane.xlu0 %493  ;;  %v735_v5 = vadd.f32 %v1405_v61, %v699_v19  ;;  %v645_v30 = vmul.f32 %v922_v48, %v1248_v11  ;;  %931 = vrsqrt.f32 %v588_v47  ;;  %v572_v40 = vmul.f32 0.0078125, %v532_v32 }
 0x259   :  { %752 = vst [vmem:[#allocation7 + $0x18] sm:$0xff] %v720_v24  ;;  %v700_v34 = vmul.f32 %v1399_v7, %v664_v10  ;;  %933 = vrsqrt.f32 %v603_v3  ;;  %v553_v50 = vmul.f32 0.0078125, %v494_v27 }
 0x25a   :  { %v924_v35 = vpop.eup %923  ;;  %767 = vst [vmem:[#allocation7 + $0x90] sm:$0xff] %v735_v5  ;;  %v681_v51 = vmul.f32 %v1399_v7, %v645_v30  ;;  %v604_v15 = vadd.f32 1e-05, %v572_v40 }
 0x25b   :  { %v926_v52 = vpop.eup %925  ;;  %v736_v20 = vadd.f32 %v1405_v61, %v700_v34  ;;  %v646_v42 = vmul.f32 %v924_v35, %v1265_v28  ;;  %v585_v62 = vadd.f32 1e-05, %v553_v50  ;;  %v496_v2 = vpop.xlane.xlu1 %495 }
 0x25c   :  { %v526_v11 = vpop.xlane.xlu0 %525  ;;  %v717_v54 = vadd.f32 %v1405_v61, %v681_v51  ;;  %v661_v44 = vmul.f32 %v926_v52, %v1260_v22  ;;  %935 = vrsqrt.f32 %v604_v15  ;;  %v554_v9 = vmul.f32 0.0078125, %v496_v2 }
 0x25d   :  { %768 = vst [vmem:[#allocation7 + $0x98] sm:$0xff] %v736_v20  ;;  %v682_v55 = vmul.f32 %v1399_v7, %v646_v42  ;;  %937 = vrsqrt.f32 %v585_v62  ;;  %v569_v18 = vmul.f32 0.0078125, %v526_v11 }
 0x25e   :  { %v928_v0 = vpop.eup %927  ;;  %749 = vst [vmem:[#allocation7] sm:$0xff] %v717_v54  ;;  %v697_v56 = vmul.f32 %v1399_v7, %v661_v44  ;;  %v586_v59 = vadd.f32 1e-05, %v554_v9 }
 0x25f   :  { %v930_v28 = vpop.eup %929  ;;  %v718_v57 = vadd.f32 %v1405_v61, %v682_v55  ;;  %v662_v26 = vmul.f32 %v928_v0, %v1268_v8  ;;  %v601_v14 = vadd.f32 1e-05, %v569_v18  ;;  %v528_v60 = vpop.xlane.xlu1 %527 }
 0x260   :  { %v506_v22 = vpop.xlane.xlu0 %505  ;;  %v733_v46 = vadd.f32 %v1405_v61, %v697_v56  ;;  %v651_v19 = vmul.f32 %v930_v28, %v1275_v36  ;;  %939 = vrsqrt.f32 %v586_v59  ;;  %v570_v47 = vmul.f32 0.0078125, %v528_v60 }
 0x261   :  { %750 = vst [vmem:[#allocation7 + $0x8] sm:$0xff] %v718_v57  ;;  %v698_v3 = vmul.f32 %v1399_v7, %v662_v26  ;;  %941 = vrsqrt.f32 %v601_v14  ;;  %v559_v48 = vmul.f32 0.0078125, %v506_v22 }
 0x262   :  { %v932_v24 = vpop.eup %931  ;;  %765 = vst [vmem:[#allocation7 + $0x80] sm:$0xff] %v733_v46  ;;  %v687_v10 = vmul.f32 %v1399_v7, %v651_v19  ;;  %v602_v32 = vadd.f32 1e-05, %v570_v47 }
 0x263   :  { %v934_v8 = vpop.eup %933  ;;  %v734_v27 = vadd.f32 %v1405_v61, %v698_v3  ;;  %v652_v5 = vmul.f32 %v932_v24, %v1280_v38  ;;  %v591_v30 = vadd.f32 1e-05, %v559_v48  ;;  %v508_v40 = vpop.xlane.xlu1 %507 }
 0x264   :  { %v538_v36 = vpop.xlane.xlu0 %537  ;;  %v723_v34 = vadd.f32 %v1405_v61, %v687_v10  ;;  %v667_v50 = vmul.f32 %v934_v8, %v1285_v63  ;;  %943 = vrsqrt.f32 %v602_v32  ;;  %v560_v35 = vmul.f32 0.0078125, %v508_v40 }
 0x265   :  { %766 = vst [vmem:[#allocation7 + $0x88] sm:$0xff] %v734_v27  ;;  %v688_v51 = vmul.f32 %v1399_v7, %v652_v5  ;;  %945 = vrsqrt.f32 %v591_v30  ;;  %v575_v15 = vmul.f32 0.0078125, %v538_v36 }
 0x266   :  { %v936_v52 = vpop.eup %935  ;;  %755 = vst [vmem:[#allocation7 + $0x30] sm:$0xff] %v723_v34  ;;  %v703_v20 = vmul.f32 %v1399_v7, %v667_v50  ;;  %v592_v42 = vadd.f32 1e-05, %v560_v35 }
 0x267   :  { %v938_v38 = vpop.eup %937  ;;  %v724_v62 = vadd.f32 %v1405_v61, %v688_v51  ;;  %v668_v2 = vmul.f32 %v936_v52, %v1288_v17  ;;  %v607_v11 = vadd.f32 1e-05, %v575_v15  ;;  %v540_v54 = vpop.xlane.xlu1 %539 }
 0x268   :  { %v502_v63 = vpop.xlane.xlu0 %501  ;;  %v739_v44 = vadd.f32 %v1405_v61, %v703_v20  ;;  %v649_v9 = vmul.f32 %v938_v38, %v1295_v12  ;;  %947 = vrsqrt.f32 %v592_v42  ;;  %v576_v55 = vmul.f32 0.0078125, %v540_v54 }
 0x269   :  { %756 = vst [vmem:[#allocation7 + $0x38] sm:$0xff] %v724_v62  ;;  %v704_v18 = vmul.f32 %v1399_v7, %v668_v2  ;;  %949 = vrsqrt.f32 %v607_v11  ;;  %v557_v0 = vmul.f32 0.0078125, %v502_v63 }
 0x26a   :  { %v940_v56 = vpop.eup %939  ;;  %771 = vst [vmem:[#allocation7 + $0xb0] sm:$0xff] %v739_v44  ;;  %v685_v59 = vmul.f32 %v1399_v7, %v649_v9  ;;  %v608_v28 = vadd.f32 1e-05, %v576_v55 }
 0x26b   :  { %v942_v17 = vpop.eup %941  ;;  %v740_v57 = vadd.f32 %v1405_v61, %v704_v18  ;;  %v650_v26 = vmul.f32 %v940_v56, %v1300_v13  ;;  %v589_v14 = vadd.f32 1e-05, %v557_v0  ;;  %v504_v60 = vpop.xlane.xlu1 %503 }
 0x26c   :  { %v534_v12 = vpop.xlane.xlu0 %533  ;;  %v721_v22 = vadd.f32 %v1405_v61, %v685_v59  ;;  %v665_v46 = vmul.f32 %v942_v17, %v1305_v4  ;;  %951 = vrsqrt.f32 %v608_v28  ;;  %v558_v19 = vmul.f32 0.0078125, %v504_v60 }
 0x26d   :  { %772 = vst [vmem:[#allocation7 + $0xb8] sm:$0xff] %v740_v57  ;;  %v686_v47 = vmul.f32 %v1399_v7, %v650_v26  ;;  %953 = vrsqrt.f32 %v589_v14  ;;  %v573_v3 = vmul.f32 0.0078125, %v534_v12 }
 0x26e   :  { %v944_v48 = vpop.eup %943  ;;  %753 = vst [vmem:[#allocation7 + $0x20] sm:$0xff] %v721_v22  ;;  %v701_v24 = vmul.f32 %v1399_v7, %v665_v46  ;;  %v590_v10 = vadd.f32 1e-05, %v558_v19 }
 0x26f   :  { %v946_v13 = vpop.eup %945  ;;  %v722_v32 = vadd.f32 %v1405_v61, %v686_v47  ;;  %v666_v8 = vmul.f32 %v944_v48, %v1308_v31  ;;  %v605_v27 = vadd.f32 1e-05, %v573_v3  ;;  %v536_v5 = vpop.xlane.xlu1 %535 }
 0x270   :  { %v514_v4 = vpop.xlane.xlu0 %513  ;;  %v737_v30 = vadd.f32 %v1405_v61, %v701_v24  ;;  %v655_v40 = vmul.f32 %v946_v13, %v1315_v29  ;;  %955 = vrsqrt.f32 %v590_v10  ;;  %v574_v36 = vmul.f32 0.0078125, %v536_v5 }
 0x271   :  { %754 = vst [vmem:[#allocation7 + $0x28] sm:$0xff] %v722_v32  ;;  %v702_v34 = vmul.f32 %v1399_v7, %v666_v8  ;;  %957 = vrsqrt.f32 %v605_v27  ;;  %v563_v50 = vmul.f32 0.0078125, %v514_v4 }
 0x272   :  { %v948_v35 = vpop.eup %947  ;;  %769 = vst [vmem:[#allocation7 + $0xa0] sm:$0xff] %v737_v30  ;;  %v691_v51 = vmul.f32 %v1399_v7, %v655_v40  ;;  %v606_v15 = vadd.f32 1e-05, %v574_v36 }
 0x273   :  { %v950_v31 = vpop.eup %949  ;;  %v738_v52 = vadd.f32 %v1405_v61, %v702_v34  ;;  %v656_v20 = vmul.f32 %v948_v35, %v1320_v33  ;;  %v595_v42 = vadd.f32 1e-05, %v563_v50  ;;  %v516_v38 = vpop.xlane.xlu1 %515 }
 0x274   :  { %v510_v29 = vpop.xlane.xlu0 %509  ;;  %v727_v62 = vadd.f32 %v1405_v61, %v691_v51  ;;  %v671_v2 = vmul.f32 %v950_v31, %v1325_v16  ;;  %959 = vrsqrt.f32 %v606_v15  ;;  %v564_v11 = vmul.f32 0.0078125, %v516_v38 }
 0x275   :  { %770 = vst [vmem:[#allocation7 + $0xa8] sm:$0xff] %v738_v52  ;;  %v692_v54 = vmul.f32 %v1399_v7, %v656_v20  ;;  %961 = vrsqrt.f32 %v595_v42  ;;  %v561_v63 = vmul.f32 0.0078125, %v510_v29 }
 0x276   :  { %v952_v44 = vpop.eup %951  ;;  %759 = vst [vmem:[#allocation7 + $0x50] sm:$0xff] %v727_v62  ;;  %v707_v9 = vmul.f32 %v1399_v7, %v671_v2  ;;  %v596_v55 = vadd.f32 1e-05, %v564_v11 }
 0x277   :  { %v954_v33 = vpop.eup %953  ;;  %v728_v18 = vadd.f32 %v1405_v61, %v692_v54  ;;  %v672_v0 = vmul.f32 %v952_v44, %v1328_v41  ;;  %v593_v56 = vadd.f32 1e-05, %v561_v63  ;;  %v512_v59 = vpop.xlane.xlu1 %511 }
 0x278   :  { %v542_v16 = vpop.xlane.xlu0 %541  ;;  %v743_v28 = vadd.f32 %v1405_v61, %v707_v9  ;;  %v653_v17 = vmul.f32 %v954_v33, %v1335_v1  ;;  %963 = vrsqrt.f32 %v596_v55  ;;  %v562_v57 = vmul.f32 0.0078125, %v512_v59 }
 0x279   :  { %760 = vst [vmem:[#allocation7 + $0x58] sm:$0xff] %v728_v18  ;;  %v708_v26 = vmul.f32 %v1399_v7, %v672_v0  ;;  %965 = vrsqrt.f32 %v593_v56  ;;  %v577_v14 = vmul.f32 0.0078125, %v542_v16 }
 0x27a   :  { %v956_v60 = vpop.eup %955  ;;  %775 = vst [vmem:[#allocation7 + $0xd0] sm:$0xff] %v743_v28  ;;  %v689_v12 = vmul.f32 %v1399_v7, %v653_v17  ;;  %v594_v22 = vadd.f32 1e-05, %v562_v57 }
 0x27b   :  { %v958_v41 = vpop.eup %957  ;;  %v744_v46 = vadd.f32 %v1405_v61, %v708_v26  ;;  %v654_v19 = vmul.f32 %v956_v60, %v1340_v6  ;;  %v609_v47 = vadd.f32 1e-05, %v577_v14  ;;  %v544_v3 = vpop.xlane.xlu1 %543 }
 0x27c   :  { %v546_v1 = vpop.xlane.xlu0 %545  ;;  %v725_v48 = vadd.f32 %v1405_v61, %v689_v12  ;;  %v669_v24 = vmul.f32 %v958_v41, %v1345_v25  ;;  %967 = vrsqrt.f32 %v594_v22  ;;  %v578_v10 = vmul.f32 0.0078125, %v544_v3 }
 0x27d   :  { %776 = vst [vmem:[#allocation7 + $0xd8] sm:$0xff] %v744_v46  ;;  %v690_v13 = vmul.f32 %v1399_v7, %v654_v19  ;;  %969 = vrsqrt.f32 %v609_v47  ;;  %v579_v32 = vmul.f32 0.0078125, %v546_v1 }
 0x27e   :  { %v960_v8 = vpop.eup %959  ;;  %757 = vst [vmem:[#allocation7 + $0x40] sm:$0xff] %v725_v48  ;;  %v705_v27 = vmul.f32 %v1399_v7, %v669_v24  ;;  %v610_v5 = vadd.f32 1e-05, %v578_v10 }
 0x27f   :  { %v962_v6 = vpop.eup %961  ;;  %v726_v4 = vadd.f32 %v1405_v61, %v690_v13  ;;  %v670_v30 = vmul.f32 %v960_v8, %v1348_v45  ;;  %v611_v40 = vadd.f32 1e-05, %v579_v32  ;;  %v548_v36 = vpop.xlane.xlu1 %547 }
 0x280   :  { %v741_v25 = vadd.f32 %v1405_v61, %v705_v27  ;;  %v659_v34 = vmul.f32 %v962_v6, %v1355_v21  ;;  %971 = vrsqrt.f32 %v610_v5  ;;  %v580_v50 = vmul.f32 0.0078125, %v548_v36 }
 0x281   :  { %758 = vst [vmem:[#allocation7 + $0x48] sm:$0xff] %v726_v4  ;;  %v706_v35 = vmul.f32 %v1399_v7, %v670_v30  ;;  %973 = vrsqrt.f32 %v611_v40 }
 0x282   :  { %v964_v51 = vpop.eup %963  ;;  %773 = vst [vmem:[#allocation7 + $0xc0] sm:$0xff] %v741_v25  ;;  %v695_v15 = vmul.f32 %v1399_v7, %v659_v34  ;;  %v612_v31 = vadd.f32 1e-05, %v580_v50 }
 0x283   :  { %v966_v52 = vpop.eup %965  ;;  %v742_v45 = vadd.f32 %v1405_v61, %v706_v35  ;;  %v660_v20 = vmul.f32 %v964_v51, %v1360_v23 }
 0x284   :  { %v731_v42 = vadd.f32 %v1405_v61, %v695_v15  ;;  %v657_v21 = vmul.f32 %v966_v52, %v1365_v39  ;;  %975 = vrsqrt.f32 %v612_v31 }
 0x285   :  { %774 = vst [vmem:[#allocation7 + $0xc8] sm:$0xff] %v742_v45  ;;  %v696_v38 = vmul.f32 %v1399_v7, %v660_v20 }
 0x286   :  { %v968_v29 = vpop.eup %967  ;;  %763 = vst [vmem:[#allocation7 + $0x70] sm:$0xff] %v731_v42  ;;  %v693_v62 = vmul.f32 %v1399_v7, %v657_v21 }
 0x287   :  { %v970_v2 = vpop.eup %969  ;;  %v732_v11 = vadd.f32 %v1405_v61, %v696_v38  ;;  %v658_v54 = vmul.f32 %v968_v29, %v1368_v49 }
 0x288   :  { %v729_v63 = vadd.f32 %v1405_v61, %v693_v62  ;;  %v673_v23 = vmul.f32 %v970_v2, %v1375_v37 }
 0x289   :  { %764 = vst [vmem:[#allocation7 + $0x78] sm:$0xff] %v732_v11  ;;  %v694_v39 = vmul.f32 %v1399_v7, %v658_v54 }
 0x28a   :  { %v972_v44 = vpop.eup %971  ;;  %761 = vst [vmem:[#allocation7 + $0x60] sm:$0xff] %v729_v63  ;;  %v709_v9 = vmul.f32 %v1399_v7, %v673_v23 }
 0x28b   :  { %v974_v55 = vpop.eup %973  ;;  %v730_v33 = vadd.f32 %v1405_v61, %v694_v39  ;;  %v674_v18 = vmul.f32 %v972_v44, %v1380_v58 }
 0x28c   :  { %v745_v0 = vadd.f32 %v1405_v61, %v709_v9  ;;  %v675_v49 = vmul.f32 %v974_v55, %v1385_v43 }
 0x28d   :  { %762 = vst [vmem:[#allocation7 + $0x68] sm:$0xff] %v730_v33  ;;  %v710_v56 = vmul.f32 %v1399_v7, %v674_v18 }
 0x28e   :  { %v976_v37 = vpop.eup %975  ;;  %777 = vst [vmem:[#allocation7 + $0xe0] sm:$0xff] %v745_v0  ;;  %v711_v59 = vmul.f32 %v1399_v7, %v675_v49 }
 0x28f   :  { %v746_v16 = vadd.f32 %v1405_v61, %v710_v56  ;;  %v676_v28 = vmul.f32 %v976_v37, %v1388_v53 }
 0x290   :  { %v747_v17 = vadd.f32 %v1405_v61, %v711_v59 }
 0x291   :  { %778 = vst [vmem:[#allocation7 + $0xe8] sm:$0xff] %v746_v16  ;;  %v712_v58 = vmul.f32 %v1399_v7, %v676_v28 }
 0x292   :  { %779 = vst [vmem:[#allocation7 + $0xf0] sm:$0xff] %v747_v17 }
 0x293   :  { %v748_v43 = vadd.f32 %v1405_v61, %v712_v58 }
 0x295   :  { %780 = vst [vmem:[#allocation7 + $0xf8] sm:$0xff] %v748_v43 }
 0x296   :  { %1032 = shalt.err (!%p1029_p6)
}
 0x297   :  { %s1033_s21 = scalar_lea.hbm %s1520_s3, 4096 }
 0x298   :  { %p1034_p7 = scmp.ne.s32.totalorder %s1520_s3, %s1033_s21  ;;  %p1037_p8 = scmp.lt.u32.totalorder %s1033_s21, %s1520_s3 }
 0x29a   :  { %p1039_p9 = pnand %p1037_p8, %p1034_p7 }
 0x29c   :  { %1042 = shalt.err (!%p1039_p9)
}
 0x29d   :  { %792 = dma.vmem_to_hbm [thread:$0]  %s787_s17, 4096, %s1520_s3, [#allocation4], %s1050_s22, %s1050_s22, %s1051_s23  }
 0x29e   :  { %1047 = dma.done.wait [#allocation4], 4096  }
 0x29f   :  { %1048 = vsyncadd [#allocation4], 4294963200 }
 0x2a0   :  { %796 = vsyncpa [#allocation3], 1 }
 0x2a1   :  { %797 = vsyncpa [#allocation6], 1 }
 0x2a2   :  { %798 = vsyncpa [#allocation4], 1 }

</bundles_post_ra>
